<compile_context>
chip_gen: v7x
topology: tpu7x:2x2x1
jax: 0.10.0
libtpu: 0.0.40
codegen_flags: <defaults>
</compile_context>

<pallas_src>
import jax
import jax.numpy as jnp
from jax.experimental import pallas as pl
from jax.experimental.pallas import tpu as pltpu


def _make_kernel(gs, has_bias):
    def kernel(x_ref, w_ref, c_ref, *rest):
        if has_bias:
            b_ref, o_ref, acc_ref = rest
        else:
            o_ref, acc_ref = rest

        k = pl.program_id(1)

        @pl.when(k == 0)
        def _():
            acc_ref[...] = jnp.zeros_like(acc_ref)

        # Main GEMM: x_blk (B, tk) contracted with w_blk (Nb, tk) on the last
        # dims (same NT pattern as q @ k.T in flash attention), f32 accumulate.
        acc_ref[...] += jax.lax.dot_general(
            x_ref[...], w_ref[...],
            dimension_numbers=(((1,), (1,)), ((), ())),
            preferred_element_type=jnp.float32)

        @pl.when(k == pl.num_programs(1) - 1)
        def _():
            y = acc_ref[...]                  # (B, Nb) float32 = x @ W_blk.T
            c = c_ref[...]                    # (2*gs-1, Nb) float32 proj bands
            nb = y.shape[-1]
            # Block-diagonal projection on the activation side:
            #   out[:, g*gs+j] = sum_i proj[g, j, i] * y[:, g*gs+i]
            # expressed over diagonals d = j - i as  sum_d C_d * roll(y, d).
            # Group boundaries never cross the block (Nb is a multiple of gs),
            # and wrapped lanes carry zero coefficients.
            out = c[gs - 1:gs, :] * y         # d == 0 band
            for idx in range(2 * gs - 1):
                d = idx - (gs - 1)
                if d == 0:
                    continue
                out = out + c[idx:idx + 1, :] * pltpu.roll(y, shift=d % nb, axis=1)
            if has_bias:
                out = out + b_ref[...].astype(jnp.float32)
            o_ref[...] = out.astype(o_ref.dtype)

    return kernel


def _proj_to_bands(proj, out_f):
    """(G, gs, gs) proj -> (2*gs-1, out_f) float32 diagonal-band coefficients."""
    G, gs, _ = proj.shape
    k = jnp.arange(out_f)
    g = k // gs
    j = k % gs
    d = jnp.arange(-(gs - 1), gs)              # (2*gs-1,)
    i = j[None, :] - d[:, None]                # (2*gs-1, out_f)
    valid = (i >= 0) & (i < gs)
    i_c = jnp.clip(i, 0, gs - 1)
    vals = proj.astype(jnp.float32)[g[None, :], j[None, :], i_c]
    return jnp.where(valid, vals, jnp.float32(0.0))


def _pick_tiles(G, gs, in_f, itemsize,
                max_weight_tile_bytes=4 * 1024 * 1024,
                min_blocks_for_pipelining=4):
    """Choose (groups per block, K tile) for the streaming GEMM."""
    # K tile: largest 128-multiple divisor of in_f up to 2048 -> each weight
    # DMA stays in the MiB sweet spot and VMEM is bounded independent of in_f.
    tile_k = in_f
    if in_f % 128 == 0:
        for cand in (2048, 1024, 512, 256, 128):
            if in_f % cand == 0:
                tile_k = cand
                break

    # Output block: Nb = Gb*gs must be lane-dense (multiple of 128) unless it
    # spans the whole output.  Prefer the largest block within the per-step
    # weight budget while keeping >=4 blocks so both v7x TensorCores pipeline.
    candidates = [gb for gb in range(1, G + 1)
                  if G % gb == 0 and (gb * gs) % 128 == 0]
    if not candidates:
        # Fallback: whole output width in one step (may emit masked stores).
        return G, tile_k

    def w_bytes(gb):
        return gb * gs * tile_k * itemsize

    fitting = [gb for gb in candidates if w_bytes(gb) <= max_weight_tile_bytes]
    if not fitting:
        fitting = [min(candidates)]
    pipelined = [gb for gb in fitting if G // gb >= min_blocks_for_pipelining]
    return (max(pipelined) if pipelined else min(fitting)), tile_k


def hqq_grouped_proj_forward(x, W, proj, bias=None):
    """x: (B, in), W: (out, in), proj: (G, gs, gs), bias: (out,)|None -> (B, out)."""
    B, in_f = x.shape
    out_f, in_f_w = W.shape
    assert in_f_w == in_f
    G, gs, gs2 = proj.shape
    assert gs == gs2 and G * gs == out_f

    W = W.astype(x.dtype)                       # weight streamed in x dtype
    bands = _proj_to_bands(proj, out_f)         # (2*gs-1, out_f) f32, tiny
    has_bias = bias is not None

    itemsize = jnp.dtype(x.dtype).itemsize
    Gb, tile_k = _pick_tiles(G, gs, in_f, itemsize)
    Nb = Gb * gs
    n_blk = G // Gb
    n_k = pl.cdiv(in_f, tile_k)                 # exact by construction

    in_specs = [
        pl.BlockSpec((B, tile_k), lambda n, k: (0, k)),        # activations
        pl.BlockSpec((Nb, tile_k), lambda n, k: (n, k)),       # weight stream
        pl.BlockSpec((2 * gs - 1, Nb), lambda n, k: (0, n)),   # proj bands
    ]
    operands = [x, W, bands]
    if has_bias:
        in_specs.append(pl.BlockSpec((1, Nb), lambda n, k: (0, n)))
        operands.append(bias.astype(x.dtype).reshape(1, out_f))

    # Per-step VMEM footprint estimate (double-buffered tiles + f32 acc).
    rows = max(B, 8)
    est = (2 * rows * tile_k * itemsize          # x tiles
           + 2 * Nb * tile_k * itemsize          # weight tiles
           + 2 * 16 * Nb * 4                     # proj bands (padded sublanes)
           + (2 * 8 * Nb * itemsize if has_bias else 0)
           + 2 * rows * Nb * itemsize            # output tiles
           + rows * Nb * 4)                      # accumulator scratch
    vmem_limit = int(min(48 * 2**20, max(2 * est, 8 * 2**20)))

    # TODO(synk): pad B to the dtype sublane tile (16 for bf16) for unmasked
    # output stores when activations are bf16 and B is small.
    return pl.pallas_call(
        _make_kernel(gs, has_bias),
        out_shape=jax.ShapeDtypeStruct((B, out_f), x.dtype),
        grid_spec=pltpu.PrefetchScalarGridSpec(
            num_scalar_prefetch=0,
            grid=(n_blk, n_k),                   # reduction axis last
            in_specs=in_specs,
            out_specs=pl.BlockSpec((B, Nb), lambda n, k: (0, n)),
            scratch_shapes=[pltpu.VMEM((B, Nb), jnp.float32)],
        ),
        compiler_params=pltpu.CompilerParams(
            dimension_semantics=("parallel", "arbitrary"),
            vmem_limit_bytes=vmem_limit,
        ),
    )(*operands)


def _reference(x, W, proj, bias):
    """Faithful port of the PyTorch forward (weight-side f32 projection)."""
    G, gs, _ = proj.shape
    out_f, in_f = W.shape
    Wp = jnp.einsum(
        "gij,gjk->gik",
        proj.astype(jnp.float32),
        W.reshape(G, gs, in_f).astype(jnp.float32),
    ).astype(x.dtype).reshape(out_f, in_f)
    out = x @ Wp.T
    if bias is not None:
        out = out + bias.astype(x.dtype)
    return out.astype(x.dtype)


if __name__ == "__main__":
    # Small but blocking-meaningful shapes consistent with the module.
    B = 8
    in_features = 256
    out_features = 512
    proj_size = 8                            # gs
    proj_num = out_features // proj_size     # 64 groups

    key = jax.random.PRNGKey(0)
    k_w, k_x, k_b, k_p = jax.random.split(key, 4)

    x_dtype = jnp.float32
    train_dtype = jnp.float32

    # Deterministic synthetic parameters (stand-in for the dequantized HQQ weight).
    # TODO(synk): the HQQ dequantize() / quantized-meta path has no Pallas
    # equivalent here; a dense weight stands in for linear_layer.dequantize().
    W = jax.random.normal(k_w, (out_features, in_features), dtype=x_dtype) * 0.1
    bias = jax.random.normal(k_b, (out_features,), dtype=x_dtype) * 0.05
    eye = jnp.eye(proj_size, dtype=train_dtype)
    proj = jnp.stack([eye] * proj_num) + 0.01 * jax.random.normal(
        k_p, (proj_num, proj_size, proj_size), dtype=train_dtype
    )
    x = jax.random.normal(k_x, (B, in_features), dtype=x_dtype)

    # With bias.
    out = jax.block_until_ready(hqq_grouped_proj_forward(x, W, proj, bias))
    ref = _reference(x, W, proj, bias)
    assert out.shape == (B, out_features)
    max_err = jnp.max(jnp.abs(out - ref))
    assert jnp.allclose(out, ref, atol=2e-3, rtol=2e-3), f"max err {max_err}"

    # Without bias (exercises the bias-free kernel variant).
    out_nb = jax.block_until_ready(hqq_grouped_proj_forward(x, W, proj, None))
    ref_nb = _reference(x, W, proj, None)
    max_err_nb = jnp.max(jnp.abs(out_nb - ref_nb))
    assert jnp.allclose(out_nb, ref_nb, atol=2e-3, rtol=2e-3), f"max err {max_err_nb}"

    print("KERNEL_OK")
</pallas_src>

<mosaic_0001>
module attributes {stable_mosaic.version = 11 : i64} {
  func.func @kernel(%arg0: i32, %arg1: i32, %arg2: memref<8x256xf32, #tpu.memory_space<vmem>>, %arg3: memref<128x256xf32, #tpu.memory_space<vmem>>, %arg4: memref<15x128xf32, #tpu.memory_space<vmem>>, %arg5: memref<1x128xf32, #tpu.memory_space<vmem>>, %arg6: memref<8x128xf32, #tpu.memory_space<vmem>>, %arg7: memref<8x128xf32, #tpu.memory_space<vmem>>) attributes {dimension_semantics = [#tpu.dimension_semantics<parallel>, #tpu.dimension_semantics<arbitrary>], iteration_bounds = array<i64: 4, 1>, scalar_prefetch = 0 : i64, scratch_operands = 1 : i64, tpu.core_type = #tpu.core_type<tc>, window_params = [{transform_indices = @transform_0, window_bounds = array<i64: 8, 256>}, {transform_indices = @transform_1, window_bounds = array<i64: 128, 256>}, {transform_indices = @transform_2, window_bounds = array<i64: 15, 128>}, {transform_indices = @transform_3, window_bounds = array<i64: 1, 128>}, {transform_indices = @transform_4, window_bounds = array<i64: 8, 128>}]} {
    %c0_i32 = arith.constant 0 : i32
    %0 = arith.cmpi eq, %arg1, %c0_i32 : i32
    %1 = arith.extui %0 : i1 to i32
    %c0_i32_0 = arith.constant 0 : i32
    %2 = arith.cmpi ne, %1, %c0_i32_0 : i32
    scf.if %2 {
      %cst_10 = arith.constant 0.000000e+00 : f32
      %12 = vector.broadcast %cst_10 : f32 to vector<8x128xf32>
      %c0_11 = arith.constant 0 : index
      %c0_12 = arith.constant 0 : index
      %13 = vector.load %arg7[%c0_11, %c0_12] : memref<8x128xf32, #tpu.memory_space<vmem>>, vector<8x128xf32>
      tpu.vector_store %arg7[%c0_11, %c0_12], %12 {strides = array<i32>} : memref<8x128xf32, #tpu.memory_space<vmem>>, vector<8x128xf32>,
    } else {
    }
    %c0 = arith.constant 0 : index
    %c0_1 = arith.constant 0 : index
    %3 = vector.load %arg7[%c0, %c0_1] : memref<8x128xf32, #tpu.memory_space<vmem>>, vector<8x128xf32>
    %c0_2 = arith.constant 0 : index
    %c0_3 = arith.constant 0 : index
    %4 = vector.load %arg2[%c0_2, %c0_3] : memref<8x256xf32, #tpu.memory_space<vmem>>, vector<8x256xf32>
    %c0_4 = arith.constant 0 : index
    %c0_5 = arith.constant 0 : index
    %5 = vector.load %arg3[%c0_4, %c0_5] : memref<128x256xf32, #tpu.memory_space<vmem>>, vector<128x256xf32>
    %cst = arith.constant dense<0.000000e+00> : vector<8x128xf32>
    %6 = tpu.matmul %4, %5, %cst {dimension_numbers = #tpu.dot_dimension_numbers<[1], [1], [0], [0], [0, 0, 1, 0], [], []>} : vector<8x256xf32>, vector<128x256xf32>, vector<8x128xf32> -> vector<8x128xf32>
    %7 = arith.addf %3, %6 : vector<8x128xf32>
    %c0_6 = arith.constant 0 : index
    %c0_7 = arith.constant 0 : index
    %8 = vector.load %arg7[%c0_6, %c0_7] : memref<8x128xf32, #tpu.memory_space<vmem>>, vector<8x128xf32>
    tpu.vector_store %arg7[%c0_6, %c0_7], %7 {strides = array<i32>} : memref<8x128xf32, #tpu.memory_space<vmem>>, vector<8x128xf32>,
    %c0_i32_8 = arith.constant 0 : i32
    %9 = arith.cmpi eq, %arg1, %c0_i32_8 : i32
    %10 = arith.extui %9 : i1 to i32
    %c0_i32_9 = arith.constant 0 : i32
    %11 = arith.cmpi ne, %10, %c0_i32_9 : i32
    scf.if %11 {
      %c0_10 = arith.constant 0 : index
      %c0_11 = arith.constant 0 : index
      %12 = vector.load %arg7[%c0_10, %c0_11] : memref<8x128xf32, #tpu.memory_space<vmem>>, vector<8x128xf32>
      %c0_12 = arith.constant 0 : index
      %c0_13 = arith.constant 0 : index
      %13 = vector.load %arg4[%c0_12, %c0_13] : memref<15x128xf32, #tpu.memory_space<vmem>>, vector<15x128xf32>
      %14 = vector.extract_strided_slice %13 {offsets = [7, 0], sizes = [1, 128], strides = [1, 1]} : vector<15x128xf32> to vector<1x128xf32>
      %15 = vector.broadcast %14 : vector<1x128xf32> to vector<8x128xf32>
      %16 = arith.mulf %15, %12 : vector<8x128xf32>
      %17 = vector.extract_strided_slice %13 {offsets = [0, 0], sizes = [1, 128], strides = [1, 1]} : vector<15x128xf32> to vector<1x128xf32>
      %c121_i32 = arith.constant 121 : i32
      %18 = tpu.dynamic_rotate %12 by %c121_i32 dim 1 : vector<8x128xf32>, i32 -> vector<8x128xf32>
      %19 = vector.broadcast %17 : vector<1x128xf32> to vector<8x128xf32>
      %20 = arith.mulf %19, %18 : vector<8x128xf32>
      %21 = arith.addf %16, %20 : vector<8x128xf32>
      %22 = vector.extract_strided_slice %13 {offsets = [1, 0], sizes = [1, 128], strides = [1, 1]} : vector<15x128xf32> to vector<1x128xf32>
      %c122_i32 = arith.constant 122 : i32
      %23 = tpu.dynamic_rotate %12 by %c122_i32 dim 1 : vector<8x128xf32>, i32 -> vector<8x128xf32>
      %24 = vector.broadcast %22 : vector<1x128xf32> to vector<8x128xf32>
      %25 = arith.mulf %24, %23 : vector<8x128xf32>
      %26 = arith.addf %21, %25 : vector<8x128xf32>
      %27 = vector.extract_strided_slice %13 {offsets = [2, 0], sizes = [1, 128], strides = [1, 1]} : vector<15x128xf32> to vector<1x128xf32>
      %c123_i32 = arith.constant 123 : i32
      %28 = tpu.dynamic_rotate %12 by %c123_i32 dim 1 : vector<8x128xf32>, i32 -> vector<8x128xf32>
      %29 = vector.broadcast %27 : vector<1x128xf32> to vector<8x128xf32>
      %30 = arith.mulf %29, %28 : vector<8x128xf32>
      %31 = arith.addf %26, %30 : vector<8x128xf32>
      %32 = vector.extract_strided_slice %13 {offsets = [3, 0], sizes = [1, 128], strides = [1, 1]} : vector<15x128xf32> to vector<1x128xf32>
      %c124_i32 = arith.constant 124 : i32
      %33 = tpu.dynamic_rotate %12 by %c124_i32 dim 1 : vector<8x128xf32>, i32 -> vector<8x128xf32>
      %34 = vector.broadcast %32 : vector<1x128xf32> to vector<8x128xf32>
      %35 = arith.mulf %34, %33 : vector<8x128xf32>
      %36 = arith.addf %31, %35 : vector<8x128xf32>
      %37 = vector.extract_strided_slice %13 {offsets = [4, 0], sizes = [1, 128], strides = [1, 1]} : vector<15x128xf32> to vector<1x128xf32>
      %c125_i32 = arith.constant 125 : i32
      %38 = tpu.dynamic_rotate %12 by %c125_i32 dim 1 : vector<8x128xf32>, i32 -> vector<8x128xf32>
      %39 = vector.broadcast %37 : vector<1x128xf32> to vector<8x128xf32>
      %40 = arith.mulf %39, %38 : vector<8x128xf32>
      %41 = arith.addf %36, %40 : vector<8x128xf32>
      %42 = vector.extract_strided_slice %13 {offsets = [5, 0], sizes = [1, 128], strides = [1, 1]} : vector<15x128xf32> to vector<1x128xf32>
      %c126_i32 = arith.constant 126 : i32
      %43 = tpu.dynamic_rotate %12 by %c126_i32 dim 1 : vector<8x128xf32>, i32 -> vector<8x128xf32>
      %44 = vector.broadcast %42 : vector<1x128xf32> to vector<8x128xf32>
      %45 = arith.mulf %44, %43 : vector<8x128xf32>
      %46 = arith.addf %41, %45 : vector<8x128xf32>
      %47 = vector.extract_strided_slice %13 {offsets = [6, 0], sizes = [1, 128], strides = [1, 1]} : vector<15x128xf32> to vector<1x128xf32>
      %c127_i32 = arith.constant 127 : i32
      %48 = tpu.dynamic_rotate %12 by %c127_i32 dim 1 : vector<8x128xf32>, i32 -> vector<8x128xf32>
      %49 = vector.broadcast %47 : vector<1x128xf32> to vector<8x128xf32>
      %50 = arith.mulf %49, %48 : vector<8x128xf32>
      %51 = arith.addf %46, %50 : vector<8x128xf32>
      %52 = vector.extract_strided_slice %13 {offsets = [8, 0], sizes = [1, 128], strides = [1, 1]} : vector<15x128xf32> to vector<1x128xf32>
      %c1_i32 = arith.constant 1 : i32
      %53 = tpu.dynamic_rotate %12 by %c1_i32 dim 1 : vector<8x128xf32>, i32 -> vector<8x128xf32>
      %54 = vector.broadcast %52 : vector<1x128xf32> to vector<8x128xf32>
      %55 = arith.mulf %54, %53 : vector<8x128xf32>
      %56 = arith.addf %51, %55 : vector<8x128xf32>
      %57 = vector.extract_strided_slice %13 {offsets = [9, 0], sizes = [1, 128], strides = [1, 1]} : vector<15x128xf32> to vector<1x128xf32>
      %c2_i32 = arith.constant 2 : i32
      %58 = tpu.dynamic_rotate %12 by %c2_i32 dim 1 : vector<8x128xf32>, i32 -> vector<8x128xf32>
      %59 = vector.broadcast %57 : vector<1x128xf32> to vector<8x128xf32>
      %60 = arith.mulf %59, %58 : vector<8x128xf32>
      %61 = arith.addf %56, %60 : vector<8x128xf32>
      %62 = vector.extract_strided_slice %13 {offsets = [10, 0], sizes = [1, 128], strides = [1, 1]} : vector<15x128xf32> to vector<1x128xf32>
      %c3_i32 = arith.constant 3 : i32
      %63 = tpu.dynamic_rotate %12 by %c3_i32 dim 1 : vector<8x128xf32>, i32 -> vector<8x128xf32>
      %64 = vector.broadcast %62 : vector<1x128xf32> to vector<8x128xf32>
      %65 = arith.mulf %64, %63 : vector<8x128xf32>
      %66 = arith.addf %61, %65 : vector<8x128xf32>
      %67 = vector.extract_strided_slice %13 {offsets = [11, 0], sizes = [1, 128], strides = [1, 1]} : vector<15x128xf32> to vector<1x128xf32>
      %c4_i32 = arith.constant 4 : i32
      %68 = tpu.dynamic_rotate %12 by %c4_i32 dim 1 : vector<8x128xf32>, i32 -> vector<8x128xf32>
      %69 = vector.broadcast %67 : vector<1x128xf32> to vector<8x128xf32>
      %70 = arith.mulf %69, %68 : vector<8x128xf32>
      %71 = arith.addf %66, %70 : vector<8x128xf32>
      %72 = vector.extract_strided_slice %13 {offsets = [12, 0], sizes = [1, 128], strides = [1, 1]} : vector<15x128xf32> to vector<1x128xf32>
      %c5_i32 = arith.constant 5 : i32
      %73 = tpu.dynamic_rotate %12 by %c5_i32 dim 1 : vector<8x128xf32>, i32 -> vector<8x128xf32>
      %74 = vector.broadcast %72 : vector<1x128xf32> to vector<8x128xf32>
      %75 = arith.mulf %74, %73 : vector<8x128xf32>
      %76 = arith.addf %71, %75 : vector<8x128xf32>
      %77 = vector.extract_strided_slice %13 {offsets = [13, 0], sizes = [1, 128], strides = [1, 1]} : vector<15x128xf32> to vector<1x128xf32>
      %c6_i32 = arith.constant 6 : i32
      %78 = tpu.dynamic_rotate %12 by %c6_i32 dim 1 : vector<8x128xf32>, i32 -> vector<8x128xf32>
      %79 = vector.broadcast %77 : vector<1x128xf32> to vector<8x128xf32>
      %80 = arith.mulf %79, %78 : vector<8x128xf32>
      %81 = arith.addf %76, %80 : vector<8x128xf32>
      %82 = vector.extract_strided_slice %13 {offsets = [14, 0], sizes = [1, 128], strides = [1, 1]} : vector<15x128xf32> to vector<1x128xf32>
      %c7_i32 = arith.constant 7 : i32
      %83 = tpu.dynamic_rotate %12 by %c7_i32 dim 1 : vector<8x128xf32>, i32 -> vector<8x128xf32>
      %84 = vector.broadcast %82 : vector<1x128xf32> to vector<8x128xf32>
      %85 = arith.mulf %84, %83 : vector<8x128xf32>
      %86 = arith.addf %81, %85 : vector<8x128xf32>
      %c0_14 = arith.constant 0 : index
      %c0_15 = arith.constant 0 : index
      %87 = vector.load %arg5[%c0_14, %c0_15] : memref<1x128xf32, #tpu.memory_space<vmem>>, vector<1x128xf32>
      %88 = vector.broadcast %87 : vector<1x128xf32> to vector<8x128xf32>
      %89 = arith.addf %86, %88 : vector<8x128xf32>
      %c0_16 = arith.constant 0 : index
      %c0_17 = arith.constant 0 : index
      %90 = vector.load %arg6[%c0_16, %c0_17] : memref<8x128xf32, #tpu.memory_space<vmem>>, vector<8x128xf32>
      tpu.vector_store %arg6[%c0_16, %c0_17], %89 {strides = array<i32>} : memref<8x128xf32, #tpu.memory_space<vmem>>, vector<8x128xf32>,
    } else {
    }
    return
  }
  func.func @transform_0(%arg0: i32, %arg1: i32) -> (i32, i32) {
    %c0_i32 = arith.constant 0 : i32
    %c0_i32_0 = arith.constant 0 : i32
    return %c0_i32, %arg1 : i32, i32
  }
  func.func @transform_1(%arg0: i32, %arg1: i32) -> (i32, i32) {
    %c0_i32 = arith.constant 0 : i32
    return %arg0, %arg1 : i32, i32
  }
  func.func @transform_2(%arg0: i32, %arg1: i32) -> (i32, i32) {
    %c0_i32 = arith.constant 0 : i32
    %c0_i32_0 = arith.constant 0 : i32
    return %c0_i32, %arg0 : i32, i32
  }
  func.func @transform_3(%arg0: i32, %arg1: i32) -> (i32, i32) {
    %c0_i32 = arith.constant 0 : i32
    %c0_i32_0 = arith.constant 0 : i32
    return %c0_i32, %arg0 : i32, i32
  }
  func.func @transform_4(%arg0: i32, %arg1: i32) -> (i32, i32) {
    %c0_i32 = arith.constant 0 : i32
    %c0_i32_0 = arith.constant 0 : i32
    return %c0_i32, %arg0 : i32, i32
  }
}

</mosaic_0001>

<bundles_post_ra>
// kernel: tpu_custom_call.1
= control target key start
LH: loop header
LB: loop body
LE: loop exit
PB: predicated region body
PF: predicated region fallthrough
CT: control target
= control target key end

     0   :  { %s1368_s0 = inlined_call_operand.hbm [shape: f32[8,256], index: 0, kind: input, shape index: {}]   ;;  %s1369_s1 = inlined_call_operand.hbm [shape: f32[512,256], index: 1, kind: input, shape index: {}]   ;;  %s1370_s2 = inlined_call_operand.hbm [shape: f32[15,512], index: 2, kind: input, shape index: {}]   ;;  %s1371_s3 = inlined_call_operand.vmem [shape: f32[1,512], index: 3, kind: input, shape index: {}]   ;;  %s1372_s4 = inlined_call_operand.hbm [shape: f32[8,512], index: 4, kind: output, shape index: {}]  }
   0x1   :  { %1378 = sst [smem:[#allocation14_spill]] %s1369_s1 }
   0x2   :  { %1379 = sst [smem:[#allocation15_spill]] %s1370_s2 }
   0x3   :  { %9 = vsyncpa [#allocation4], 0 }
   0x4   :  { %10 = vsyncpa [#allocation7], 0 }
   0x5   :  { %12 = vsyncpa [#allocation7 + $0x1], 0 }
   0x6   :  { %13 = vsyncpa [#allocation5], 0 }
   0x7   :  { %15 = vsyncpa [#allocation5 + $0x1], 0  ;;  %s1065_s15 = smov 0   ;;  %s1067_s16 = smov 0  }
   0x8   :  { %s1069_s17 = smov 0   ;;  %s1071_s18 = smov 0  }
   0x9   :  { %s1073_s19 = smov 0   ;;  %s1075_s20 = smov 0  }
   0xa LB: > { %s33_s21 = sadd.s32 1, %s1011_s19  ;;  %s68_s22 = sadd.s32 1, %s1003_s17  ;;  %s1015_s20 = sphi %s1075_s20, %s21_s20   ;;  %s1011_s19 = sphi %s1073_s19, %s1400_s19   ;;  %s1007_s18 = sphi %s1071_s18, %s1399_s18   ;;  %s1003_s17 = sphi %s1069_s17, %s1398_s17   ;;  %s999_s16 = sphi %s1067_s16, %s1397_s16   ;;  %s995_s15 = sphi %s1065_s15, %s1396_s15  }
   0xb   : > { %p35_p0 = scmp.ge.s32.totalorder %s33_s21, 4  ;;  %p75_p1 = scmp.ne.s32.totalorder %s1003_s17, %s999_s16 }
   0xc   : > { %p76_p2 = scmp.eq.s32.totalorder %s1015_s20, 0  ;;  %p770_p4 = scmp.lt.s32.totalorder %s1015_s20, 4 }
   0xd   : > { %s1402_s21 = smov (%p35_p0, %s33_s21), 0  ;;  %s197_s24 = sand.u32 1, %s1015_s20  }
   0xe   : > { %1380 = sst [smem:[#allocation13_spill]] %s1402_s21  ;;  %p77_p3 = por %p76_p2, %p75_p1 }
   0xf   : > { %s63_s23 = ssub.s32 %s1011_s19, %s1402_s21  ;;  %s199_s25 = sand.u32 1, %s1003_s17  }
  0x10   : > { %p66_p5 = scmp.eq.s32.totalorder %s63_s23, 0  ;;  %s711_s26 = sshll.u32 %s1011_s19, 12 }
  0x11   : > { %s694_s28 = sshll.u32 %s199_s25, 8  ;;  %s1381_s1 = sld [smem:[#allocation14_spill]] }
  0x12   : > { %s1112_s27 = scalar_select %p66_p5, %s1003_s17, %s68_s22  }
  0x13   : > { %p1119_p6 = pnand %p770_p4, %p77_p3  ;;  %s201_s7 = scalar_lea.vmem [#allocation6], %s694_s28 }
  0x14   : > { %s211_s8 = sshll.u32 %s201_s7, 4  ;;  %s1125_s9 = sshll.u32 %s199_s25, 4  ;;  %s1123_s8 = int_to_ptr.vmem [resolvable:$true] %s211_s8 }
  0x15   : > { %s1127_s10 = scalar_lea.sflag [#allocation7], %s197_s24  ;;  %p843_p8 = pneg %p1119_p6 }
  0x17   : > { %s1117_s5 = scalar_lea.hbm %s1381_s1, %s711_s26  ;;  %s846_s14 = scalar_lea.hbm %s1381_s1, 16384 }
  0x18   : > { %s841_s11 = scalar_lea.hbm %s1117_s5, 4096  ;;  %p847_p11 = scmp.lt.u32.totalorder %s1117_s5, %s1381_s1 }
  0x19   : > { %p842_p7 = scmp.ne.s32.totalorder %s1117_s5, %s841_s11  ;;  %p848_p12 = scmp.lt.u32.totalorder %s846_s14, %s841_s11 }
  0x1a   : > { %p850_p0 = scmp.lt.u32.totalorder %s841_s11, %s1117_s5 }
  0x1b   : > { %p844_p9 = pnand %p843_p8, %p842_p7  ;;  %p849_p13 = por %p848_p12, %p847_p11 }
  0x1d   : > { %p845_p10 = pneg %p844_p9  ;;  %p851_p2 = por %p850_p0, %p849_p13 }
  0x1f   : > { %p852_p3 = pnand %p851_p2, %p845_p10 }
  0x21   : > { %855 = shalt.err (!%p852_p3)
}
  0x22   : > { %s856_s24 = scalar_lea.vmem %s1123_s8, 4096  ;;  %s1017_s25 = smov [#allocation6]  }
  0x23   : > { %p857_p4 = scmp.ne.s32.totalorder %s1123_s8, %s856_s24  ;;  %s861_s26 = sshll.u32 %s1017_s25, 4  ;;  %s862_s26 = int_to_ptr.vmem [resolvable:$false] %s861_s26 }
  0x24   : > { %s863_s28 = scalar_lea.vmem %s862_s26, 8192  ;;  %p864_p9 = scmp.lt.s32.totalorder %s1123_s8, %s862_s26 }
  0x25   : > { %p859_p5 = pnand %p857_p4, %p843_p8  ;;  %p865_p11 = scmp.lt.s32.totalorder %s863_s28, %s856_s24 }
  0x27   : > { %p860_p7 = pneg %p859_p5  ;;  %p866_p12 = por %p865_p11, %p864_p9 }
  0x29   : > { %p867_p13 = pnand %p866_p12, %p860_p7 }
  0x2b   : > { %870 = shalt.err (!%p867_p13)
}
  0x2c   : > { %s1018_s29 = smov 256   ;;  %s1019_s30 = smov 16  }
  0x2d   : > { %761 = dma.hbm_to_vmem [thread:$0]  (!%p1119_p6), %s1117_s5, 4096, %s1123_s8, %s1127_s10, %s1018_s29, %s1018_s29, %s1019_s30  }
  0x2e   : > { %s225_s7 = scalar_lea.vmem [#allocation8], %s1125_s9  ;;  %s1159_s12 = sadd.s32 4294967295, %s1015_s20  }
  0x2f   : > { %s231_s11 = sshll.u32 %s225_s7, 4  ;;  %s690_s13 = sadd.s32 4294967294, %s1015_s20   ;;  %s1156_s11 = int_to_ptr.vmem [resolvable:$true] %s231_s11 }
  0x30   : > { %p81_p10 = scmp.ne.s32.totalorder %s999_s16, %s995_s15  ;;  %p1373_p0 = scmp.eq.s32.totalorder %s1159_s12, 0 }
  0x31   : > { %p157_p2 = scmp.eq.s32.totalorder %s1159_s12, 3  ;;  %p163_p3 = scmp.eq.s32.totalorder %s690_s13, 3 }
  0x32   : > { %p691_p4 = scmp.ge.s32.totalorder %s1015_s20, 1  ;;  %p1169_p5 = por %p1373_p0, %p81_p10 }
  0x33   : > { %p1176_p7 = por %p157_p2, %p75_p1  ;;  %p1180_p9 = por %p163_p3, %p81_p10 }
  0x34   : > { %s1383_s5 = scalar_select %p1169_p5, 1, 0 }
  0x35   : > { %s1384_s8 = scalar_select %p1176_p7, 1, 0 }
  0x36   : > { %s1385_s9 = scalar_select %p1180_p9, 1, 0 }
  0x37   : > { %p170_p11 = scmp.lt.s32.totalorder %s1015_s20, 5  ;;  %s1020_s22 = smov [#allocation3]  }
  0x38   : > { %s186_s23 = sshll.u32 %s1020_s22, 4  ;;  %s699_s24 = sshll.u32 %s1011_s19, 7  ;;  %s1189_s23 = int_to_ptr.vmem [resolvable:$true] %s186_s23 }
  0x39   : > { %p1185_p12 = pnand %p691_p4, %p170_p11  ;;  %s1387_s2 = sld [smem:[#allocation15_spill]] }
  0x3b   : > { %s1386_s14 = scalar_select %p1185_p12, 1, 0 }
  0x3c   : > { %p754_p1 = pneg %p1185_p12 }
  0x3e   : > { %p1201_p13 = pnand %p754_p1, %p1373_p0 }
  0x3f   : > { %s1197_s28 = scalar_lea.hbm %s1387_s2, %s699_s24  ;;  %s876_s22 = scalar_lea.hbm %s1387_s2, 1024 }
  0x40   : > { %s871_s30 = scalar_lea.hbm %s1197_s28, 256  ;;  %p877_p4 = scmp.lt.u32.totalorder %s1197_s28, %s1387_s2 }
  0x41   : > { %p872_p10 = scmp.ne.s32.totalorder %s1197_s28, %s871_s30  ;;  %p878_p11 = scmp.lt.u32.totalorder %s876_s22, %s871_s30 }
  0x42   : > { %p880_p1 = scmp.lt.u32.totalorder %s871_s30, %s1197_s28 }
  0x43   : > { %p874_p2 = pnand %p872_p10, %p843_p8  ;;  %p879_p9 = por %p878_p11, %p877_p4 }
  0x45   : > { %p875_p3 = pneg %p874_p2  ;;  %p881_p0 = por %p880_p1, %p879_p9 }
  0x47   : > { %p882_p7 = pnand %p881_p0, %p875_p3 }
  0x49   : > { %885 = shalt.err (!%p882_p7)
}
  0x4a   : > { %s886_s26 = scalar_lea.vmem %s1156_s11, 256  ;;  %s1021_s7 = smov [#allocation8]  }
  0x4b   : > { %p887_p10 = scmp.ne.s32.totalorder %s1156_s11, %s886_s26  ;;  %s891_s13 = sshll.u32 %s1021_s7, 4  ;;  %s892_s13 = int_to_ptr.vmem [resolvable:$false] %s891_s13 }
  0x4c   : > { %s893_s24 = scalar_lea.vmem %s892_s13, 512  ;;  %p894_p12 = scmp.lt.s32.totalorder %s1156_s11, %s892_s13 }
  0x4d   : > { %p889_p2 = pnand %p887_p10, %p843_p8  ;;  %p895_p4 = scmp.lt.s32.totalorder %s893_s24, %s886_s26 }
  0x4f   : > { %p890_p5 = pneg %p889_p2  ;;  %p896_p11 = por %p895_p4, %p894_p12 }
  0x51   : > { %p897_p9 = pnand %p896_p11, %p890_p5 }
  0x53   : > { %900 = shalt.err (!%p897_p9)
}
  0x54   : > { %s1022_s30 = smov 512   ;;  %s1023_s22 = smov 128  }
  0x55   : > { %s1024_s25 = smov 8   ;;  %s901_s7 = scalar_lea.hbm %s1368_s0, 256 }
  0x56   : > { %764 = dma.hbm_to_vmem [thread:$0]  (!%p1119_p6), %s1197_s28, 256, %s1156_s11, %s1127_s10, %s1022_s30, %s1023_s22, %s1024_s25  }
  0x57   : > { %p902_p8 = scmp.ne.s32.totalorder %s1368_s0, %s901_s7  ;;  %p903_p0 = pneg %p1201_p13 }
  0x58   : > { %p908_p12 = scmp.lt.u32.totalorder %s901_s7, %s1368_s0 }
  0x59   : > { %p904_p5 = pnand %p903_p0, %p902_p8 }
  0x5b   : > { %p905_p7 = pneg %p904_p5 }
  0x5d   : > { %p910_p3 = pnand %p908_p12, %p905_p7 }
  0x5f   : > { %913 = shalt.err (!%p910_p3)
}
  0x60   : > { %s914_s6 = scalar_lea.vmem %s1189_s23, 256  ;;  %p922_p2 = scmp.lt.s32.totalorder %s1189_s23, %s1189_s23 }
  0x61   : > { %p915_p6 = scmp.ne.s32.totalorder %s1189_s23, %s914_s6  ;;  %p923_p4 = scmp.lt.s32.totalorder %s914_s6, %s914_s6 }
  0x63   : > { %p917_p1 = pnand %p915_p6, %p903_p0  ;;  %p924_p11 = por %p923_p4, %p922_p2 }
  0x65   : > { %p918_p10 = pneg %p917_p1 }
  0x67   : > { %p925_p9 = pnand %p924_p11, %p918_p10 }
  0x69   : > { %928 = shalt.err (!%p925_p9)
}
  0x6a   : > { %757 = dma.hbm_to_vmem [thread:$0]  (!%p1201_p13), %s1368_s0, 256, %s1189_s23, [#allocation4]  }
  0x6b   : > { %p1389_p8 = scmp.ne.s32.totalorder %s1386_s14, 0 }
  0x6c   : > { %p1390_p5 = scmp.eq.s32.totalorder (!%p1389_p8), %s1159_s12, 0 }
  0x6d   : > { %249 = sbr.rel (%p1389_p8) target bundleno = 564 (0x234), region = 36 }
  0x74   : > { %982 = dma.done.wait (%p1390_p5), [#allocation4], 256   ;;  %p1391_p0 = pmov %p1390_p5 }
  0x75   : > { %s255_s21 = sand.u32 1, %s1159_s12   ;;  %s1258_s10 = sand.u32 1, %s999_s16  }
  0x76   : > { %984 = vsyncadd (%p1391_p0), [#allocation4], 4294967040  ;;  %s702_s11 = sshll.u32 %s1258_s10, 8  ;;  %s256_s28 = scalar_lea.sflag [#allocation7], %s255_s21 }
  0x77   : > { %s1261_s29 = scalar_lea.vmem [#allocation6], %s702_s11  ;;  %p1392_p13 = scmp.ne.s32.totalorder %s1383_s5, 0 }
  0x79   : > { %986 = dma.done.wait (%p1392_p13), %s256_s28, 4352  }
  0x7a   : > { %988 = vsyncadd (%p1392_p13), %s256_s28, 4294962944  ;;  %v316_v0 = vld [vmem:[%s1261_s29 + $0x8] sm:$0xff]  ;;  %v318_v1 = vld [vmem:[%s1261_s29 + $0x18] sm:$0xff]  ;;  %s1025_s12 = smov 123   ;;  %s1026_s5 = smov 121   ;;  %v425_v52 = vlaneseq }
  0x7b   : > { %v315_v2 = vld [vmem:[%s1261_s29] sm:$0xff]  ;;  %v712_v3 = vpack.c.bf16 %v318_v1, %v316_v0  ;;  %v317_v4 = vld [vmem:[%s1261_s29 + $0x10] sm:$0xff]  ;;  %v320_v5 = vld [vmem:[%s1261_s29 + $0x28] sm:$0xff]  ;;  %s1027_s14 = smov 124   ;;  %s1028_s23 = smov 122  }
  0x7c   : > { %v322_v6 = vld [vmem:[%s1261_s29 + $0x38] sm:$0xff]  ;;  %v714_v7 = vpack.c.bf16 %v317_v4, %v315_v2  ;;  %v319_v9 = vld [vmem:[%s1261_s29 + $0x20] sm:$0xff]  ;;  %v321_v10 = vld [vmem:[%s1261_s29 + $0x30] sm:$0xff]  ;;  %s1029_s30 = smov 126   ;;  %s1030_s22 = smov 125   ;;  %v1300_v53 = vshrl.u32 %v425_v52, 7 }
  0x7d   : > { %v716_v8 = vpack.c.bf16 %v322_v6, %v320_v5  ;;  %713 = vmatprep.subr.bf16.mxu0 %v712_v3  ;;  %v324_v11 = vld [vmem:[%s1261_s29 + $0x48] sm:$0xff]  ;;  %v326_v12 = vld [vmem:[%s1261_s29 + $0x58] sm:$0xff]  ;;  %v718_v13 = vpack.c.bf16 %v321_v10, %v319_v9  ;;  %v323_v16 = vld [vmem:[%s1261_s29 + $0x40] sm:$0xff]  ;;  %s1031_s25 = smov 1   ;;  %s1032_s7 = smov 127  }
  0x7e   : > { %715 = vmatpush1.bf16.xpose.msra.mxu0 %v714_v7  ;;  %v720_v14 = vpack.c.bf16 %v326_v12, %v324_v11  ;;  %v314_v15 = vld [vmem:[#allocation3 + $0x8] sm:$0xff]  ;;  %v325_v17 = vld [vmem:[%s1261_s29 + $0x50] sm:$0xff]  ;;  %v328_v18 = vld [vmem:[%s1261_s29 + $0x68] sm:$0xff]  ;;  %s1033_s13 = smov 3   ;;  %s1034_s26 = smov 2   ;;  %v434_v54 = vsub.s32 0, %v1300_v53 }
  0x7f   : > { %717 = vmatprep.subr.bf16.mxu0 %v716_v8  ;;  %411 = vmatprep.mubr.f32.mxu0 %v314_v15  ;;  %v330_v19 = vld [vmem:[%s1261_s29 + $0x78] sm:$0xff]  ;;  %v722_v20 = vpack.c.bf16 %v325_v17, %v323_v16  ;;  %v327_v22 = vld [vmem:[%s1261_s29 + $0x60] sm:$0xff]  ;;  %v329_v23 = vld [vmem:[%s1261_s29 + $0x70] sm:$0xff]  ;;  %s1035_s24 = smov 5   ;;  %s1036_s6 = smov 4   ;;  %v427_v55 = vsub.s32 7, %v1300_v53 }
  0x80   : > { %v724_v21 = vpack.c.bf16 %v330_v19, %v328_v18  ;;  %v332_v24 = vld [vmem:[%s1261_s29 + $0x88] sm:$0xff]  ;;  %v334_v25 = vld [vmem:[%s1261_s29 + $0x98] sm:$0xff]  ;;  %v726_v26 = vpack.c.bf16 %v329_v23, %v327_v22  ;;  %v331_v28 = vld [vmem:[%s1261_s29 + $0x80] sm:$0xff]  ;;  %s1037_s1 = smov 7   ;;  %s1038_s2 = smov 6   ;;  %v442_v58 = vsub.s32 1, %v1300_v53 }
  0x81   : > { %v728_v27 = vpack.c.bf16 %v334_v25, %v332_v24  ;;  %v333_v29 = vld [vmem:[%s1261_s29 + $0x90] sm:$0xff]  ;;  %v336_v30 = vld [vmem:[%s1261_s29 + $0xa8] sm:$0xff]  ;;  %v338_v31 = vld [vmem:[%s1261_s29 + $0xb8] sm:$0xff]  ;;  %s703_s21 = sshll.u32 %s1258_s10, 4  ;;  %v450_v59 = vsub.s32 2, %v1300_v53  ;;  %v458_v0 = vsub.s32 3, %v1300_v53 }
  0x82   : > { %v730_v32 = vpack.c.bf16 %v333_v29, %v331_v28  ;;  %v732_v33 = vpack.c.bf16 %v338_v31, %v336_v30  ;;  %v335_v34 = vld [vmem:[%s1261_s29 + $0xa0] sm:$0xff]  ;;  %v337_v35 = vld [vmem:[%s1261_s29 + $0xb0] sm:$0xff]  ;;  %v340_v36 = vld [vmem:[%s1261_s29 + $0xc8] sm:$0xff]  ;;  %s268_s11 = scalar_lea.vmem [#allocation8], %s703_s21  ;;  %v466_v4 = vsub.s32 4, %v1300_v53  ;;  %v474_v10 = vsub.s32 5, %v1300_v53 }
  0x83   : > { %v342_v37 = vld [vmem:[%s1261_s29 + $0xd8] sm:$0xff]  ;;  %v734_v38 = vpack.c.bf16 %v337_v35, %v335_v34  ;;  %v339_v40 = vld [vmem:[%s1261_s29 + $0xc0] sm:$0xff]  ;;  %v341_v41 = vld [vmem:[%s1261_s29 + $0xd0] sm:$0xff]  ;;  %p304_p7 = scmp.lt.s32.totalorder %s1007_s18, 3  ;;  %p1393_p3 = scmp.ne.s32.totalorder %s1384_s8, 0 }
  0x84   : > { %v736_v39 = vpack.c.bf16 %v342_v37, %v340_v36  ;;  %v344_v42 = vld [vmem:[%s1261_s29 + $0xe8] sm:$0xff]  ;;  %v346_v43 = vld [vmem:[%s1261_s29 + $0xf8] sm:$0xff]  ;;  %v738_v44 = vpack.c.bf16 %v341_v41, %v339_v40  ;;  %v343_v46 = vld [vmem:[%s1261_s29 + $0xe0] sm:$0xff] }
  0x85   : > { %v740_v45 = vpack.c.bf16 %v346_v43, %v344_v42  ;;  %v345_v47 = vld [vmem:[%s1261_s29 + $0xf0] sm:$0xff]  ;;  %s305_s28 = scalar_select %p304_p7, %s1007_s18, 3 }
  0x86   : > { %719 = vmatpush1.bf16.xpose.msra.mxu0 %v718_v13  ;;  %v742_v48 = vpack.c.bf16 %v345_v47, %v343_v46  ;;  %v313_v49 = vld [vmem:[#allocation3] sm:$0xff]  ;;  %s704_s29 = sshll.u32 %s1258_s10, 3 }
  0x87   : > { %721 = vmatprep.subr.bf16.mxu0 %v720_v14  ;;  %v423_v56 = vld [vmem:[%s268_s11] sm:$0xff]  ;;  %v482_v14 = vsub.s32 6, %v1300_v53 }
  0x88   : > { %v435_v57 = vrot.slane %v423_v56, %v434_v54  ;;  %v428_v60 = vrot.slane %v423_v56, %v427_v55  ;;  %v443_v1 = vrot.slane %v423_v56, %v442_v58  ;;  %v451_v2 = vrot.slane %v423_v56, %v450_v59 }
  0x89   : > { %v459_v8 = vrot.slane %v423_v56, %v458_v0  ;;  %v467_v13 = vrot.slane %v423_v56, %v466_v4  ;;  %v475_v19 = vrot.slane %v423_v56, %v474_v10  ;;  %v483_v23 = vrot.slane %v423_v56, %v482_v14 }
  0x8e   : > { %723 = vmatpush1.bf16.xpose.msra.mxu0 %v722_v20  ;;  %v424_v20 = vld [vmem:[%s268_s11 + $0x8] sm:$0x7f] }
  0x8f   : > { %725 = vmatprep.subr.bf16.mxu0 %v724_v21  ;;  %v491_v28 = vrot.slane %v424_v20, %v434_v54  ;;  %v499_v31 = vrot.slane %v424_v20, %v442_v58  ;;  %v507_v36 = vrot.slane %v424_v20, %v450_v59  ;;  %v531_v47 = vrot.slane %v424_v20, %v474_v10 }
  0x96   : > { %727 = vmatpush1.bf16.xpose.msra.mxu0 %v726_v26 }
  0x97   : > { %729 = vmatprep.subr.bf16.mxu0 %v728_v27 }
  0x9e   : > { %731 = vmatpush1.bf16.xpose.msra.mxu0 %v730_v32 }
  0x9f   : > { %733 = vmatprep.subr.bf16.mxu0 %v732_v33 }
  0xa6   : > { %735 = vmatpush1.bf16.xpose.msra.mxu0 %v734_v38 }
  0xa7   : > { %737 = vmatprep.subr.bf16.mxu0 %v736_v39  ;;  %v515_v39 = vrot.slane %v424_v20, %v458_v0 }
  0xae   : > { %739 = vmatpush1.bf16.xpose.msra.mxu0 %v738_v44  ;;  %v523_v44 = vrot.slane %v424_v20, %v466_v4 }
  0xaf   : > { %741 = vmatprep.subr.bf16.mxu0 %v740_v45 }
  0xb6   : > { %743 = vmatpush1.bf16.xpose.msra.mxu0 %v742_v48 }
  0xbd   : > { %412 = vmatmul.mubr.f32.vlgmr.msra.gmra.mrb[0].mxu0 %v313_v49 }
 0x190   : > { %v413_v50 = vpop.f32.mrb[0].mxu0 }
 0x191   : > { %446 = vrot.lane.b32.xlu1 %v413_v50, %s1025_s12  ;;  %430 = vrot.lane.b32.xlu0 %v413_v50, %s1026_s5  ;;  %v415_v51 = vpop.f32.mrb[1].mxu0  ;;  %v429_v3 = vmul.f32 %v428_v60, %v413_v50 }
 0x192   : > { %v539_v51 = vrot.slane %v424_v20, %v482_v14 }
 0x195   : > { %454 = vrot.lane.b32.xlu1 %v413_v50, %s1027_s14  ;;  %438 = vrot.lane.b32.xlu0 %v413_v50, %s1028_s23  ;;  %s306_s14 = scalar_lea.vmem %s1371_s3, %s305_s28  ;;  %s707_s23 = sshll.u32 %s1007_s18, 7 }
 0x196   : > { %s1039_s18 = smov [#allocation9]  }
 0x199   : > { %470 = vrot.lane.b32.xlu1 %v413_v50, %s1029_s30  ;;  %462 = vrot.lane.b32.xlu0 %v413_v50, %s1030_s22  ;;  %s300_s30 = scalar_lea.vmem [#allocation9], %s704_s29 }
 0x19a   : > { %s565_s22 = sshll.u32 %s300_s30, 4  ;;  %s1322_s22 = int_to_ptr.vmem [resolvable:$true] %s565_s22 }
 0x19d   : > { %486 = vrot.lane.b32.xlu1 %v413_v50, %s1031_s25  ;;  %478 = vrot.lane.b32.xlu0 %v413_v50, %s1032_s7 }
 0x1a1   : > { %502 = vrot.lane.b32.xlu1 %v413_v50, %s1033_s13  ;;  %494 = vrot.lane.b32.xlu0 %v413_v50, %s1034_s26  ;;  %s1320_s13 = scalar_lea.hbm %s1372_s4, %s707_s23  ;;  %s552_s26 = scalar_lea.sflag [#allocation5], %s1258_s10 }
 0x1a5   : > { %518 = vrot.lane.b32.xlu1 %v413_v50, %s1035_s24  ;;  %510 = vrot.lane.b32.xlu0 %v413_v50, %s1036_s6  ;;  %s929_s24 = scalar_lea.vmem %s1322_s22, 128  ;;  %s933_s6 = sshll.u32 %s1039_s18, 4  ;;  %s934_s6 = int_to_ptr.vmem [resolvable:$false] %s933_s6 }
 0x1a6   : > { %p930_p12 = scmp.ne.s32.totalorder %s1322_s22, %s929_s24  ;;  %p936_p10 = scmp.lt.s32.totalorder %s1322_s22, %s934_s6 }
 0x1a8   : > { %p931_p6 = pnand %p930_p12, %p1393_p3 }
 0x1a9   : > { %534 = vrot.lane.b32.xlu1 %v413_v50, %s1037_s1  ;;  %526 = vrot.lane.b32.xlu0 %v413_v50, %s1038_s2  ;;  %s935_s1 = scalar_lea.vmem %s934_s6, 256 }
 0x1aa   : > { %p932_p1 = pneg %p931_p6  ;;  %p937_p2 = scmp.lt.s32.totalorder %s935_s1, %s929_s24 }
 0x1ac   : > { %p938_p4 = por %p937_p2, %p936_p10 }
 0x1ae   : > { %p939_p11 = pnand %p938_p4, %p932_p1 }
 0x203   : > { %v447_v61 = vpop.permute.xlu1 %446  ;;  %v431_v62 = vpop.permute.xlu0 %430 }
 0x204   : > { %v436_v63 = vmul.f32 %v435_v57, %v431_v62  ;;  %v452_v11 = vmul.f32 %v451_v2, %v447_v61  ;;  %v705_v57 = vld [vmem:[%s306_s14] ss:$0 sm:$0xff] }
 0x206   : > { %v437_v7 = vadd.f32 %v436_v63, %v429_v3 }
 0x207   : > { %v455_v5 = vpop.permute.xlu1 %454  ;;  %v439_v6 = vpop.permute.xlu0 %438 }
 0x208   : > { %v444_v9 = vmul.f32 %v443_v1, %v439_v6  ;;  %v460_v17 = vmul.f32 %v459_v8, %v455_v5 }
 0x20a   : > { %v445_v12 = vadd.f32 %v444_v9, %v437_v7 }
 0x20b   : > { %v471_v15 = vpop.permute.xlu1 %470  ;;  %v463_v16 = vpop.permute.xlu0 %462 }
 0x20c   : > { %v453_v18 = vadd.f32 %v452_v11, %v445_v12  ;;  %v468_v22 = vmul.f32 %v467_v13, %v463_v16  ;;  %v476_v26 = vmul.f32 %v475_v19, %v471_v15 }
 0x20e   : > { %v461_v21 = vadd.f32 %v460_v17, %v453_v18 }
 0x20f   : > { %v487_v24 = vpop.permute.xlu1 %486  ;;  %v479_v25 = vpop.permute.xlu0 %478 }
 0x210   : > { %v469_v27 = vadd.f32 %v468_v22, %v461_v21  ;;  %v484_v30 = vmul.f32 %v483_v23, %v479_v25  ;;  %v492_v34 = vmul.f32 %v491_v28, %v487_v24 }
 0x212   : > { %v477_v29 = vadd.f32 %v476_v26, %v469_v27 }
 0x213   : > { %v503_v32 = vpop.permute.xlu1 %502  ;;  %v495_v33 = vpop.permute.xlu0 %494 }
 0x214   : > { %v485_v35 = vadd.f32 %v484_v30, %v477_v29  ;;  %v500_v38 = vmul.f32 %v499_v31, %v495_v33  ;;  %v508_v42 = vmul.f32 %v507_v36, %v503_v32 }
 0x216   : > { %v493_v37 = vadd.f32 %v492_v34, %v485_v35 }
 0x217   : > { %v519_v40 = vpop.permute.xlu1 %518  ;;  %v511_v41 = vpop.permute.xlu0 %510 }
 0x218   : > { %v501_v43 = vadd.f32 %v500_v38, %v493_v37  ;;  %v516_v46 = vmul.f32 %v515_v39, %v511_v41  ;;  %v524_v49 = vmul.f32 %v523_v44, %v519_v40 }
 0x21a   : > { %v509_v45 = vadd.f32 %v508_v42, %v501_v43 }
 0x21b   : > { %v527_v48 = vpop.permute.xlu0 %526  ;;  %v535_v52 = vpop.permute.xlu1 %534 }
 0x21c   : > { %v517_v50 = vadd.f32 %v516_v46, %v509_v45  ;;  %v532_v54 = vmul.f32 %v531_v47, %v527_v48  ;;  %v540_v55 = vmul.f32 %v539_v51, %v535_v52 }
 0x21e   : > { %v525_v53 = vadd.f32 %v524_v49, %v517_v50 }
 0x220   : > { %v533_v56 = vadd.f32 %v532_v54, %v525_v53 }
 0x222   : > { %v541_v58 = vadd.f32 %v540_v55, %v533_v56 }
 0x224   : > { %v549_v59 = vadd.f32 %v705_v57, %v541_v58 }
 0x226   : > { %550 = vst [vmem:[%s300_s30] sm:$0xff] %v549_v59 }
 0x227   : > { %942 = shalt.err (!%p939_p11)
}
 0x228   : > { %s943_s10 = scalar_lea.hbm %s1320_s13, 128  ;;  %s947_s11 = scalar_lea.hbm %s1372_s4, 512 }
 0x229   : > { %p944_p9 = scmp.ne.s32.totalorder %s1320_s13, %s943_s10  ;;  %p948_p0 = scmp.lt.u32.totalorder %s1320_s13, %s1372_s4 }
 0x22a   : > { %p949_p13 = scmp.lt.u32.totalorder %s947_s11, %s943_s10  ;;  %p951_p12 = scmp.lt.u32.totalorder %s943_s10, %s1320_s13 }
 0x22b   : > { %p945_p8 = pnand %p944_p9, %p1393_p3 }
 0x22c   : > { %p950_p7 = por %p949_p13, %p948_p0 }
 0x22d   : > { %p946_p5 = pneg %p945_p8 }
 0x22e   : > { %p952_p6 = por %p951_p12, %p950_p7 }
 0x230   : > { %p953_p1 = pnand %p952_p6, %p946_p5 }
 0x232   : > { %956 = shalt.err (!%p953_p1)
}
 0x233   : > { %752 = dma.vmem_to_hbm [thread:$0]  (%p1393_p3), %s1322_s22, 128, %s1320_s13, %s552_s26  }
 0x234 PF: > { %p772_p10 = scmp.ge.s32.totalorder %s1015_s20, 2  ;;  %s577_s12 = sand.u32 1, %s995_s15  }
 0x235   : > { %p1394_p2 = scmp.ne.s32.totalorder %s1385_s9, 0  ;;  %s578_s5 = scalar_lea.sflag [#allocation5], %s577_s12 }
 0x237   : > { %p766_p4 = pnand %p772_p10, %p1394_p2 }
 0x239   : > { %990 = dma.done.wait (!%p766_p4), %s578_s5, 128  }
 0x23a   : > { %992 = vsyncadd (!%p766_p4), %s578_s5, 4294967168  ;;  %s21_s20 = sadd.s32 1, %s1015_s20   ;;  %s1395_s8 = sld [smem:[#allocation13_spill]] }
 0x23b   : > { %p18_p11 = scmp.ge.s32.totalorder %s21_s20, 6   ;;  %s1396_s15 = smov %s999_s16 }
 0x23c   : > { %s1397_s16 = smov %s1003_s17  ;;  %s1398_s17 = smov %s1112_s27 }
 0x23d   : > { %s1399_s18 = smov %s1011_s19  ;;  %20 = sbr.rel (!%p18_p11) target bundleno = 10 (0xa), region = 109 }
 0x240   : > { %s1400_s19 = smov %s1395_s8 }
 0x244   :  { %583 = vsyncpa [#allocation4], 1 }
 0x245   :  { %585 = vsyncpa [#allocation4 + $0x1], 1 }
 0x246   :  { %586 = vsyncpa [#allocation7], 1 }
 0x247   :  { %588 = vsyncpa [#allocation7 + $0x1], 1 }
 0x248   :  { %589 = vsyncpa [#allocation5], 1 }
 0x249   :  { %591 = vsyncpa [#allocation5 + $0x1], 1 }

</bundles_post_ra>
